<compile_context>
chip_gen: v6e
topology: v6e:2x2x1
jax: 0.10.0
libtpu: 0.0.40
codegen_flags: <defaults>
</compile_context>

<pallas_src>
import functools

import jax
import jax.numpy as jnp
from jax import lax
from jax.experimental import pallas as pl
from jax.experimental.pallas import tpu as pltpu


def _dsc_kernel(x_ref, w_ref, b_ref, o_ref, *,
                TH, Wout, KH, KW, Cin, Cout, shift):
    """Compute TH output rows of the (optionally down-shifted) conv.

    x_ref : (Hp, Wp, Cin)       zero-padded NHWC image (resident per batch)
    w_ref : (KH*KW, Cout, Cin)  weight-normed filter taps
    b_ref : (Cout, 1)           bias (f32)
    o_ref : (Cout, TH*Wout)     lane-dense, channel-major output tile
    """
    t = pl.program_id(1)
    r0 = pl.multiple_of(t * TH, TH)          # first output row of this tile
    M = TH * Wout

    # Per-tap MXU dots accumulated in f32, producing channel-major (Cout, M)
    # directly (transposed contraction) -> no im2col scratch, no result
    # transpose, no masked Cin-wide stores.
    acc = None
    for kh in range(KH):
        for kw in range(KW):
            idx = kh * KW + kw
            patch = x_ref[pl.ds(r0 + kh, TH), kw:kw + Wout, :]   # (TH, Wout, Cin)
            patch = patch.reshape(M, Cin)                        # lane dim (Cin) kept minor
            part = lax.dot_general(
                w_ref[idx], patch,                               # (Cout,Cin) x (M,Cin)
                dimension_numbers=(((1,), (1,)), ((), ())),
                preferred_element_type=jnp.float32)              # -> (Cout, M)
            acc = part if acc is None else acc + part

    acc = acc + b_ref[...]                                       # (Cout, 1) lane-bcast
    o_ref[...] = acc.astype(o_ref.dtype)

    if shift:
        # down_shift zeroes the very first output row (global row 0) AFTER the
        # bias add; the rest of the shift is folded into the extra top pad row.
        # Only the first row tile of each image needs this.
        @pl.when(t == 0)
        def _():
            o_ref[:, :Wout] = jnp.zeros((Cout, Wout), o_ref.dtype)


def _pick_row_tile(Hout, Wout, Hp, Wp, Cin, Cout, elt, budget=24 << 20):
    """Largest TH dividing Hout with a lane-dense (TH*Wout % 128 == 0) output
    block that fits a per-generation-safe VMEM budget (v7x: 64 MiB physical)."""
    resident = 2 * Hp * Wp * Cin * elt            # double-buffered per-batch image

    def cost(th):
        out_blk = 2 * Cout * th * Wout * elt      # double-buffered output tile
        acc = 4 * Cout * th * Wout                # f32 accumulator (regs / spill)
        return resident + out_blk + acc

    cands = [th for th in range(Hout, 0, -1)
             if Hout % th == 0 and ((th * Wout) % 128 == 0 or th == Hout)]
    for th in cands:                               # largest first
        if cost(th) <= budget:
            return th
    return cands[-1]                               # smallest legal tile


def down_shifted_conv2d_pallas(x_nchw, v, g, bias, *, filter_size=(2, 3),
                               shift_output_down=False):
    """x_nchw: [B, Cin, H, W].  v: [Cout, Cin, KH, KW], g: [Cout,1,1,1], bias: [Cout]."""
    KH, KW = filter_size
    B, Cin, H, W = x_nchw.shape
    Cout = v.shape[0]
    shift = 1 if shift_output_down else 0
    pw = (KW - 1) // 2
    dt = x_nchw.dtype
    elt = jnp.dtype(dt).itemsize

    # weight_norm (dim=0): w = g * v / ||v||, norm over (Cin, KH, KW) per filter.
    vn = jnp.sqrt(jnp.sum(v.astype(jnp.float32) ** 2, axis=(1, 2, 3), keepdims=True))
    w_oihw = g * v / vn                                           # (Cout,Cin,KH,KW)
    # Per-tap layout (KH*KW, Cout, Cin) so the kernel slices (Cout, Cin) taps.
    w_taps = jnp.transpose(w_oihw, (2, 3, 0, 1)).reshape(KH * KW, Cout, Cin)
    w_taps = w_taps.astype(dt)

    # NCHW -> NHWC + zero pad.  Top pad is KH-1, plus one extra row when the
    # output is down-shifted (shift folded into the conv window).
    x_nhwc = jnp.transpose(x_nchw, (0, 2, 3, 1))
    x_pad = jnp.pad(x_nhwc, ((0, 0), (KH - 1 + shift, 0), (pw, pw), (0, 0)))

    Hp = H + KH - 1 + shift
    Wp = W + 2 * pw
    Wout = Wp - KW + 1
    Hout = H                     # exactly H output rows (shift already folded)

    TH = _pick_row_tile(Hout, Wout, Hp, Wp, Cin, Cout, elt)
    nH = Hout // TH

    kernel = functools.partial(_dsc_kernel, TH=TH, Wout=Wout, KH=KH, KW=KW,
                               Cin=Cin, Cout=Cout, shift=shift)

    cost = pl.CostEstimate(
        flops=2 * B * Hout * Wout * Cout * KH * KW * Cin,
        transcendentals=0,
        bytes_accessed=int(x_pad.size * elt + B * Cout * Hout * Wout * elt
                           + w_taps.size * elt + Cout * 4),
    )

    out_cm = pl.pallas_call(
        kernel,
        out_shape=jax.ShapeDtypeStruct((B, Cout, Hout * Wout), dt),
        grid_spec=pltpu.PrefetchScalarGridSpec(
            num_scalar_prefetch=0,
            grid=(B, nH),
            in_specs=[
                # Padded image: revisited block (index depends only on b) ->
                # DMA'd once per batch element, resident across row tiles.
                pl.BlockSpec((None, Hp, Wp, Cin), lambda b, t: (b, 0, 0, 0)),
                pl.BlockSpec((KH * KW, Cout, Cin), lambda b, t: (0, 0, 0)),
                pl.BlockSpec((Cout, 1), lambda b, t: (0, 0)),
            ],
            out_specs=pl.BlockSpec((None, Cout, TH * Wout),
                                   lambda b, t: (b, 0, t)),
        ),
        compiler_params=pltpu.CompilerParams(
            # Batch axis parallel (dual-TC split on v7x lands here), row tiles
            # sequential so the per-batch image block is DMA'd once per core.
            dimension_semantics=("parallel", "arbitrary"),
            vmem_limit_bytes=32 * 1024 * 1024,
        ),
        cost_estimate=cost,
    )(x_pad, w_taps, bias.reshape(Cout, 1).astype(jnp.float32))

    # Channel-major output -> NCHW is just a free metadata reshape.
    return out_cm.reshape(B, Cout, Hout, Wout)


if __name__ == "__main__":
    # Small shapes consistent with the module: batch=2, Cin=4, Cout=8, 16x16.
    B, Cin, Cout, H, W = 2, 4, 8, 16, 16
    KH, KW = 2, 3

    key = jax.random.PRNGKey(0)
    kx, kv, kg, kb = jax.random.split(key, 4)
    x = jax.random.normal(kx, (B, Cin, H, W), dtype=jnp.float32)
    v = jax.random.normal(kv, (Cout, Cin, KH, KW), dtype=jnp.float32) * 0.1
    g = jax.random.normal(kg, (Cout, 1, 1, 1), dtype=jnp.float32) * 0.5 + 1.0
    bias = jax.random.normal(kb, (Cout,), dtype=jnp.float32) * 0.1

    # Reference: XLA convolution with identical weight_norm semantics.
    vn = jnp.sqrt(jnp.sum(v ** 2, axis=(1, 2, 3), keepdims=True))
    w_eff = g * v / vn
    conv_ref = jax.lax.conv_general_dilated(
        x, w_eff, window_strides=(1, 1),
        padding=((KH - 1, 0), ((KW - 1) // 2, (KW - 1) // 2)),
        dimension_numbers=("NCHW", "OIHW", "NCHW"),
    ) + bias[None, :, None, None]

    for shift_down in (False, True):
        out = down_shifted_conv2d_pallas(x, v, g, bias,
                                         filter_size=(KH, KW),
                                         shift_output_down=shift_down)
        out = jax.block_until_ready(out)
        ref = conv_ref
        if shift_down:
            ref = jnp.pad(conv_ref[:, :, :H - 1, :],
                          ((0, 0), (0, 0), (1, 0), (0, 0)))
        assert out.shape == ref.shape, (out.shape, ref.shape)
        assert jnp.allclose(out, ref, atol=1e-4, rtol=1e-4), \
            float(jnp.max(jnp.abs(out - ref)))

    print("KERNEL_OK")
</pallas_src>

<mosaic_0001>
module attributes {stable_mosaic.version = 11 : i64} {
  func.func @_dsc_kernel(%arg0: i32, %arg1: i32, %arg2: memref<1x17x18x4xf32, #tpu.memory_space<vmem>>, %arg3: memref<6x8x4xf32, #tpu.memory_space<vmem>>, %arg4: memref<8x1xf32, #tpu.memory_space<vmem>>, %arg5: memref<1x8x256xf32, #tpu.memory_space<vmem>>) attributes {dimension_semantics = [#tpu.dimension_semantics<parallel>, #tpu.dimension_semantics<arbitrary>], iteration_bounds = array<i64: 2, 1>, scalar_prefetch = 0 : i64, scratch_operands = 0 : i64, tpu.core_type = #tpu.core_type<tc>, window_params = [{transform_indices = @transform_0, window_bounds = array<i64: 1, 17, 18, 4>}, {pipeline_mode = #tpu.pipeline_mode<synchronous>, transform_indices = @transform_1, window_bounds = array<i64: 6, 8, 4>}, {pipeline_mode = #tpu.pipeline_mode<synchronous>, transform_indices = @transform_2, window_bounds = array<i64: 8, 1>}, {transform_indices = @transform_3, window_bounds = array<i64: 1, 8, 256>}]} {
    %c16_i32 = arith.constant 16 : i32
    %0 = arith.muli %arg1, %c16_i32 : i32
    %1 = tpu.assume_multiple %0, 16 : i32
    %c0_i32 = arith.constant 0 : i32
    %2 = arith.addi %1, %c0_i32 : i32
    %c0 = arith.constant 0 : index
    %3 = arith.index_cast %2 : i32 to index
    %c0_0 = arith.constant 0 : index
    %c0_1 = arith.constant 0 : index
    %4 = vector.load %arg2[%c0, %3, %c0_0, %c0_1] : memref<1x17x18x4xf32, #tpu.memory_space<vmem>>, vector<1x16x16x4xf32>
    %5 = vector.shape_cast %4 : vector<1x16x16x4xf32> to vector<16x16x4xf32>
    %6 = vector.shape_cast %5 : vector<16x16x4xf32> to vector<256x4xf32>
    %c0_2 = arith.constant 0 : index
    %c0_3 = arith.constant 0 : index
    %c0_4 = arith.constant 0 : index
    %7 = vector.load %arg3[%c0_2, %c0_3, %c0_4] : memref<6x8x4xf32, #tpu.memory_space<vmem>>, vector<1x8x4xf32>
    %8 = vector.shape_cast %7 : vector<1x8x4xf32> to vector<8x4xf32>
    %cst = arith.constant dense<0.000000e+00> : vector<8x256xf32>
    %9 = tpu.matmul %8, %6, %cst {dimension_numbers = #tpu.dot_dimension_numbers<[1], [1], [0], [0], [0, 0, 1, 0], [], []>} : vector<8x4xf32>, vector<256x4xf32>, vector<8x256xf32> -> vector<8x256xf32>
    %c0_i32_5 = arith.constant 0 : i32
    %10 = arith.addi %1, %c0_i32_5 : i32
    %c0_6 = arith.constant 0 : index
    %11 = arith.index_cast %10 : i32 to index
    %c1 = arith.constant 1 : index
    %c0_7 = arith.constant 0 : index
    %12 = vector.load %arg2[%c0_6, %11, %c1, %c0_7] : memref<1x17x18x4xf32, #tpu.memory_space<vmem>>, vector<1x16x16x4xf32>
    %13 = vector.shape_cast %12 : vector<1x16x16x4xf32> to vector<16x16x4xf32>
    %14 = vector.shape_cast %13 : vector<16x16x4xf32> to vector<256x4xf32>
    %c1_8 = arith.constant 1 : index
    %c0_9 = arith.constant 0 : index
    %c0_10 = arith.constant 0 : index
    %15 = vector.load %arg3[%c1_8, %c0_9, %c0_10] : memref<6x8x4xf32, #tpu.memory_space<vmem>>, vector<1x8x4xf32>
    %16 = vector.shape_cast %15 : vector<1x8x4xf32> to vector<8x4xf32>
    %cst_11 = arith.constant dense<0.000000e+00> : vector<8x256xf32>
    %17 = tpu.matmul %16, %14, %cst_11 {dimension_numbers = #tpu.dot_dimension_numbers<[1], [1], [0], [0], [0, 0, 1, 0], [], []>} : vector<8x4xf32>, vector<256x4xf32>, vector<8x256xf32> -> vector<8x256xf32>
    %18 = arith.addf %9, %17 : vector<8x256xf32>
    %c0_i32_12 = arith.constant 0 : i32
    %19 = arith.addi %1, %c0_i32_12 : i32
    %c0_13 = arith.constant 0 : index
    %20 = arith.index_cast %19 : i32 to index
    %c2 = arith.constant 2 : index
    %c0_14 = arith.constant 0 : index
    %21 = vector.load %arg2[%c0_13, %20, %c2, %c0_14] : memref<1x17x18x4xf32, #tpu.memory_space<vmem>>, vector<1x16x16x4xf32>
    %22 = vector.shape_cast %21 : vector<1x16x16x4xf32> to vector<16x16x4xf32>
    %23 = vector.shape_cast %22 : vector<16x16x4xf32> to vector<256x4xf32>
    %c2_15 = arith.constant 2 : index
    %c0_16 = arith.constant 0 : index
    %c0_17 = arith.constant 0 : index
    %24 = vector.load %arg3[%c2_15, %c0_16, %c0_17] : memref<6x8x4xf32, #tpu.memory_space<vmem>>, vector<1x8x4xf32>
    %25 = vector.shape_cast %24 : vector<1x8x4xf32> to vector<8x4xf32>
    %cst_18 = arith.constant dense<0.000000e+00> : vector<8x256xf32>
    %26 = tpu.matmul %25, %23, %cst_18 {dimension_numbers = #tpu.dot_dimension_numbers<[1], [1], [0], [0], [0, 0, 1, 0], [], []>} : vector<8x4xf32>, vector<256x4xf32>, vector<8x256xf32> -> vector<8x256xf32>
    %27 = arith.addf %18, %26 : vector<8x256xf32>
    %c1_i32 = arith.constant 1 : i32
    %28 = arith.addi %1, %c1_i32 : i32
    %c0_19 = arith.constant 0 : index
    %29 = arith.index_cast %28 : i32 to index
    %c0_20 = arith.constant 0 : index
    %c0_21 = arith.constant 0 : index
    %30 = vector.load %arg2[%c0_19, %29, %c0_20, %c0_21] : memref<1x17x18x4xf32, #tpu.memory_space<vmem>>, vector<1x16x16x4xf32>
    %31 = vector.shape_cast %30 : vector<1x16x16x4xf32> to vector<16x16x4xf32>
    %32 = vector.shape_cast %31 : vector<16x16x4xf32> to vector<256x4xf32>
    %c3 = arith.constant 3 : index
    %c0_22 = arith.constant 0 : index
    %c0_23 = arith.constant 0 : index
    %33 = vector.load %arg3[%c3, %c0_22, %c0_23] : memref<6x8x4xf32, #tpu.memory_space<vmem>>, vector<1x8x4xf32>
    %34 = vector.shape_cast %33 : vector<1x8x4xf32> to vector<8x4xf32>
    %cst_24 = arith.constant dense<0.000000e+00> : vector<8x256xf32>
    %35 = tpu.matmul %34, %32, %cst_24 {dimension_numbers = #tpu.dot_dimension_numbers<[1], [1], [0], [0], [0, 0, 1, 0], [], []>} : vector<8x4xf32>, vector<256x4xf32>, vector<8x256xf32> -> vector<8x256xf32>
    %36 = arith.addf %27, %35 : vector<8x256xf32>
    %c1_i32_25 = arith.constant 1 : i32
    %37 = arith.addi %1, %c1_i32_25 : i32
    %c0_26 = arith.constant 0 : index
    %38 = arith.index_cast %37 : i32 to index
    %c1_27 = arith.constant 1 : index
    %c0_28 = arith.constant 0 : index
    %39 = vector.load %arg2[%c0_26, %38, %c1_27, %c0_28] : memref<1x17x18x4xf32, #tpu.memory_space<vmem>>, vector<1x16x16x4xf32>
    %40 = vector.shape_cast %39 : vector<1x16x16x4xf32> to vector<16x16x4xf32>
    %41 = vector.shape_cast %40 : vector<16x16x4xf32> to vector<256x4xf32>
    %c4 = arith.constant 4 : index
    %c0_29 = arith.constant 0 : index
    %c0_30 = arith.constant 0 : index
    %42 = vector.load %arg3[%c4, %c0_29, %c0_30] : memref<6x8x4xf32, #tpu.memory_space<vmem>>, vector<1x8x4xf32>
    %43 = vector.shape_cast %42 : vector<1x8x4xf32> to vector<8x4xf32>
    %cst_31 = arith.constant dense<0.000000e+00> : vector<8x256xf32>
    %44 = tpu.matmul %43, %41, %cst_31 {dimension_numbers = #tpu.dot_dimension_numbers<[1], [1], [0], [0], [0, 0, 1, 0], [], []>} : vector<8x4xf32>, vector<256x4xf32>, vector<8x256xf32> -> vector<8x256xf32>
    %45 = arith.addf %36, %44 : vector<8x256xf32>
    %c1_i32_32 = arith.constant 1 : i32
    %46 = arith.addi %1, %c1_i32_32 : i32
    %c0_33 = arith.constant 0 : index
    %47 = arith.index_cast %46 : i32 to index
    %c2_34 = arith.constant 2 : index
    %c0_35 = arith.constant 0 : index
    %48 = vector.load %arg2[%c0_33, %47, %c2_34, %c0_35] : memref<1x17x18x4xf32, #tpu.memory_space<vmem>>, vector<1x16x16x4xf32>
    %49 = vector.shape_cast %48 : vector<1x16x16x4xf32> to vector<16x16x4xf32>
    %50 = vector.shape_cast %49 : vector<16x16x4xf32> to vector<256x4xf32>
    %c5 = arith.constant 5 : index
    %c0_36 = arith.constant 0 : index
    %c0_37 = arith.constant 0 : index
    %51 = vector.load %arg3[%c5, %c0_36, %c0_37] : memref<6x8x4xf32, #tpu.memory_space<vmem>>, vector<1x8x4xf32>
    %52 = vector.shape_cast %51 : vector<1x8x4xf32> to vector<8x4xf32>
    %cst_38 = arith.constant dense<0.000000e+00> : vector<8x256xf32>
    %53 = tpu.matmul %52, %50, %cst_38 {dimension_numbers = #tpu.dot_dimension_numbers<[1], [1], [0], [0], [0, 0, 1, 0], [], []>} : vector<8x4xf32>, vector<256x4xf32>, vector<8x256xf32> -> vector<8x256xf32>
    %54 = arith.addf %45, %53 : vector<8x256xf32>
    %c0_39 = arith.constant 0 : index
    %c0_40 = arith.constant 0 : index
    %55 = vector.load %arg4[%c0_39, %c0_40] : memref<8x1xf32, #tpu.memory_space<vmem>>, vector<8x1xf32>
    %56 = vector.broadcast %55 : vector<8x1xf32> to vector<8x256xf32>
    %57 = arith.addf %54, %56 : vector<8x256xf32>
    %c0_41 = arith.constant 0 : index
    %c0_42 = arith.constant 0 : index
    %c0_43 = arith.constant 0 : index
    %58 = vector.load %arg5[%c0_41, %c0_42, %c0_43] : memref<1x8x256xf32, #tpu.memory_space<vmem>>, vector<1x8x256xf32>
    %59 = vector.shape_cast %58 : vector<1x8x256xf32> to vector<8x256xf32>
    %60 = vector.shape_cast %57 : vector<8x256xf32> to vector<1x8x256xf32>
    tpu.vector_store %arg5[%c0_41, %c0_42, %c0_43], %60 {strides = array<i32>} : memref<1x8x256xf32, #tpu.memory_space<vmem>>, vector<1x8x256xf32>,
    return
  }
  func.func @transform_0(%arg0: i32, %arg1: i32) -> (i32, i32, i32, i32) {
    %c0_i32 = arith.constant 0 : i32
    %c0_i32_0 = arith.constant 0 : i32
    %c0_i32_1 = arith.constant 0 : i32
    %c0_i32_2 = arith.constant 0 : i32
    return %arg0, %c0_i32, %c0_i32_0, %c0_i32_1 : i32, i32, i32, i32
  }
  func.func @transform_1(%arg0: i32, %arg1: i32) -> (i32, i32, i32) {
    %c0_i32 = arith.constant 0 : i32
    %c0_i32_0 = arith.constant 0 : i32
    %c0_i32_1 = arith.constant 0 : i32
    %c0_i32_2 = arith.constant 0 : i32
    return %c0_i32, %c0_i32_0, %c0_i32_1 : i32, i32, i32
  }
  func.func @transform_2(%arg0: i32, %arg1: i32) -> (i32, i32) {
    %c0_i32 = arith.constant 0 : i32
    %c0_i32_0 = arith.constant 0 : i32
    %c0_i32_1 = arith.constant 0 : i32
    return %c0_i32, %c0_i32_0 : i32, i32
  }
  func.func @transform_3(%arg0: i32, %arg1: i32) -> (i32, i32, i32) {
    %c0_i32 = arith.constant 0 : i32
    %c0_i32_0 = arith.constant 0 : i32
    return %arg0, %c0_i32, %arg1 : i32, i32, i32
  }
}

</mosaic_0001>

<bundles_post_ra>
// kernel: tpu_custom_call.1
= control target key start
LH: loop header
LB: loop body
LE: loop exit
PB: predicated region body
PF: predicated region fallthrough
CT: control target
= control target key end

     0   :  { %8 = vsyncpa [#allocation3], 0  ;;  %s2995_s0 = inlined_call_operand.vmem [shape: f32[2,17,18,4], index: 0, kind: input, shape index: {}]   ;;  %s2996_s1 = inlined_call_operand.vmem [shape: f32[6,8,4], index: 1, kind: input, shape index: {}]   ;;  %s2997_s2 = inlined_call_operand.vmem [shape: f32[8,1], index: 2, kind: input, shape index: {}]   ;;  %s2998_s3 = inlined_call_operand.hbm [shape: f32[2,8,256], index: 3, kind: output, shape index: {}]  }
   0x1   :  { %10 = vsyncpa [#allocation3 + $0x1], 0  ;;  %s2199_s12 = smov 0   ;;  %s2201_s13 = smov 0  }
   0x2   :  { %s2203_s14 = smov 0   ;;  %s2205_s15 = smov 0  }
   0x3   :  { %s2207_s16 = smov 0   ;;  %s2209_s17 = smov 0  }
   0x4 LB: > { %s1525_s18 = sadd.s32 4294967295, %s2175_s17   ;;  %s1526_s19 = sadd.s32 4294967294, %s2175_s17   ;;  %s2175_s17 = sphi %s2209_s17, %s16_s17   ;;  %s2171_s16 = sphi %s2207_s16, %s3023_s16   ;;  %s2167_s15 = sphi %s2205_s15, %s3022_s15   ;;  %s2163_s14 = sphi %s2203_s14, %s3021_s14   ;;  %s2159_s13 = sphi %s2201_s13, %s3020_s13   ;;  %s2155_s12 = sphi %s2199_s12, %s3019_s12  }
   0x5   : > { %s28_s20 = sadd.s32 1, %s2171_s16  ;;  %s105_s21 = sadd.s32 1, %s2163_s14 }
   0x6   : > { %p30_p0 = scmp.ge.s32.totalorder %s28_s20, 2  ;;  %p115_p1 = scmp.ne.s32.totalorder %s2163_s14, %s2159_s13 }
   0x7   : > { %p116_p2 = scmp.eq.s32.totalorder %s1525_s18, 1  ;;  %p121_p3 = scmp.ne.s32.totalorder %s2159_s13, %s2155_s12 }
   0x8   : > { %s3025_s20 = smov (%p30_p0, %s28_s20), 0  ;;  %p122_p5 = scmp.eq.s32.totalorder %s1526_s19, 1 }
   0x9   : > { %p2239_p4 = por %p116_p2, %p115_p1  ;;  %s100_s23 = ssub.s32 %s2171_s16, %s3025_s20 }
   0xa   : > { %p1529_p6 = scmp.ge.s32.totalorder %s2175_s17, 1  ;;  %p103_p7 = scmp.eq.s32.totalorder %s100_s23, 0 }
   0xb   : > { %p2246_p8 = por %p122_p5, %p121_p3  ;;  %p154_p9 = scmp.lt.s32.totalorder %s2175_s17, 3 }
   0xc   : > { %s2252_s25 = scalar_select %p103_p7, %s2163_s14, %s105_s21  }
   0xd   : > { %p155_p10 = pnand %p1529_p6, %p154_p9 }
   0xf   : > { %158 = sbr.rel (%p155_p10) target bundleno = 435 (0x1b3), region = 32 }
  0x14   : > { %p178_p11 = scmp.lt.s32.totalorder %s2167_s15, 1  ;;  %vm254_vm0 = vcmask 31744   ;;  %v2258_v0 = vld [vmem:[%s2996_s1 + $0x8] sm:$0xff]  ;;  %v2263_v1 = vld [vmem:[%s2996_s1] sm:$0xff]  ;;  %s175_s28 = sand.u32 1, %s2159_s13  }
  0x15   : > { %1869 = vmatprep.mubr.msk.f32.mxu0 %vm254_vm0, %v2258_v0  ;;  %1903 = vmatprep.mubr.msk.f32.mxu1 %vm254_vm0, %v2263_v1  ;;  %s1530_s29 = sshll.u32 %s175_s28, 4  ;;  %s1433_s9 = scalar_lea.sflag [#allocation3], %s175_s28 }
  0x16   : > { %s179_s30 = scalar_select %p178_p11, %s2167_s15, 1 }
  0x17   : > { %s2178_s11 = smov [#allocation2]  }
  0x18   : > { %s2041_s4 = smul.u32 408, %s179_s30  ;;  %s1836_s30 = sshll.u32 %s2167_s15, 8 }
  0x19   : > { %s1447_s8 = scalar_lea.hbm %s2998_s3, %s1836_s30  ;;  %s2103_s15 = sshll.u32 %s2178_s11, 4  ;;  %s2104_s15 = int_to_ptr.vmem [resolvable:$false] %s2103_s15 }
  0x1a   : > { %s2273_s7 = scalar_lea.vmem %s2995_s0, %s2041_s4  ;;  %s177_s4 = scalar_lea.vmem [#allocation2], %s1530_s29 }
  0x1b   : > { %v2276_v2 = vld [vmem:[%s2273_s7 + $0x171] sm:$0xff]  ;;  %v2292_v6 = vld [vmem:[%s2273_s7 + $0x169] sm:$0xff]  ;;  %v2312_v10 = vld [vmem:[%s2273_s7 + $0x159] sm:$0xff]  ;;  %s1449_s5 = sshll.u32 %s177_s4, 4  ;;  %s2105_s18 = scalar_lea.vmem %s2104_s15, 512  ;;  %s1450_s5 = int_to_ptr.vmem [resolvable:$true] %s1449_s5 }
  0x1c   : > { %v2279_v3 = vld [vmem:[%s2273_s7 + $0x170] sm:$0xff]  ;;  %1837 = vmatprep.subr.msk.mxu0 %vm254_vm0, %v2276_v2  ;;  %v2295_v7 = vld [vmem:[%s2273_s7 + $0x168] sm:$0xff]  ;;  %v2315_v11 = vld [vmem:[%s2273_s7 + $0x158] sm:$0xff]  ;;  %s2099_s10 = scalar_lea.vmem %s1450_s5, 256  ;;  %p2106_p1 = scmp.lt.s32.totalorder %s1450_s5, %s2104_s15 }
  0x1d   : > { %v2282_v4 = vld [vmem:[%s2273_s7 + $0xb1] sm:$0xff]  ;;  %1871 = vmatprep.subr.msk.mxu1 %vm254_vm0, %v2279_v3  ;;  %v2306_v8 = vld [vmem:[%s2273_s7 + $0xa9] sm:$0xff]  ;;  %v2326_v12 = vld [vmem:[%s2273_s7 + $0x99] sm:$0xff]  ;;  %p2100_p12 = scmp.ne.s32.totalorder %s1450_s5, %s2099_s10  ;;  %p2107_p2 = scmp.lt.s32.totalorder %s2105_s18, %s2099_s10 }
  0x1e   : > { %v2289_v5 = vld [vmem:[%s2273_s7 + $0xb0] sm:$0xff]  ;;  %1838 = vmatpush3.xpose.msk.msra.mxu0 %vm254_vm0, %v2282_v4  ;;  %v2309_v9 = vld [vmem:[%s2273_s7 + $0xa8] sm:$0xff]  ;;  %v2329_v13 = vld [vmem:[%s2273_s7 + $0x98] sm:$0xff] }
  0x1f   : > { %1872 = vmatpush3.xpose.msk.msra.mxu1 %vm254_vm0, %v2289_v5  ;;  %1839 = vmatprep.subr.msk.mxu0 %vm254_vm0, %v2292_v6  ;;  %v2332_v14 = vld [vmem:[%s2273_s7 + $0x151] sm:$0xff]  ;;  %v2352_v18 = vld [vmem:[%s2273_s7 + $0x141] sm:$0xff]  ;;  %v2372_v22 = vld [vmem:[%s2273_s7 + $0x139] sm:$0xff]  ;;  %p2101_p13 = pnand %p2100_p12, %p2239_p4  ;;  %p2108_p3 = por %p2107_p2, %p2106_p1 }
  0x20   : > { %1873 = vmatprep.subr.msk.mxu1 %vm254_vm0, %v2295_v7  ;;  %v2335_v15 = vld [vmem:[%s2273_s7 + $0x150] sm:$0xff]  ;;  %v2355_v19 = vld [vmem:[%s2273_s7 + $0x140] sm:$0xff]  ;;  %v2375_v23 = vld [vmem:[%s2273_s7 + $0x138] sm:$0xff] }
  0x21   : > { %v2346_v16 = vld [vmem:[%s2273_s7 + $0x91] sm:$0xff]  ;;  %v2366_v20 = vld [vmem:[%s2273_s7 + $0x81] sm:$0xff]  ;;  %v2386_v24 = vld [vmem:[%s2273_s7 + $0x79] sm:$0xff]  ;;  %p2102_p0 = pneg %p2101_p13 }
  0x22   : > { %1840 = vmatpush3.xpose.msk.msra.mxu0 %vm254_vm0, %v2306_v8  ;;  %v2349_v17 = vld [vmem:[%s2273_s7 + $0x90] sm:$0xff]  ;;  %v2369_v21 = vld [vmem:[%s2273_s7 + $0x80] sm:$0xff]  ;;  %v2389_v25 = vld [vmem:[%s2273_s7 + $0x78] sm:$0xff] }
  0x23   : > { %1874 = vmatpush3.xpose.msk.msra.mxu1 %vm254_vm0, %v2309_v9  ;;  %1841 = vmatprep.subr.msk.mxu0 %vm254_vm0, %v2312_v10  ;;  %v2392_v26 = vld [vmem:[%s2273_s7 + $0x129] sm:$0xff]  ;;  %v2412_v30 = vld [vmem:[%s2273_s7 + $0x121] sm:$0xff]  ;;  %v2432_v34 = vld [vmem:[%s2273_s7 + $0x111] sm:$0xff]  ;;  %p2109_p5 = pnand %p2108_p3, %p2102_p0 }
  0x24   : > { %1875 = vmatprep.subr.msk.mxu1 %vm254_vm0, %v2315_v11  ;;  %v2395_v27 = vld [vmem:[%s2273_s7 + $0x128] sm:$0xff]  ;;  %v2415_v31 = vld [vmem:[%s2273_s7 + $0x120] sm:$0xff]  ;;  %v2435_v35 = vld [vmem:[%s2273_s7 + $0x110] sm:$0xff] }
  0x25   : > { %v2406_v28 = vld [vmem:[%s2273_s7 + $0x69] sm:$0xff]  ;;  %v2426_v32 = vld [vmem:[%s2273_s7 + $0x61] sm:$0xff]  ;;  %v2446_v36 = vld [vmem:[%s2273_s7 + $0x51] sm:$0xff] }
  0x26   : > { %1842 = vmatpush3.xpose.msk.msra.mxu0 %vm254_vm0, %v2326_v12  ;;  %v2409_v29 = vld [vmem:[%s2273_s7 + $0x68] sm:$0xff]  ;;  %v2429_v33 = vld [vmem:[%s2273_s7 + $0x60] sm:$0xff]  ;;  %v2449_v37 = vld [vmem:[%s2273_s7 + $0x50] sm:$0xff] }
  0x27   : > { %1876 = vmatpush3.xpose.msk.msra.mxu1 %vm254_vm0, %v2329_v13  ;;  %1843 = vmatprep.subr.msk.mxu0 %vm254_vm0, %v2332_v14  ;;  %v2452_v38 = vld [vmem:[%s2273_s7 + $0x109] sm:$0xff]  ;;  %v2472_v42 = vld [vmem:[%s2273_s7 + $0xf9] sm:$0xff]  ;;  %v2492_v46 = vld [vmem:[%s2273_s7 + $0xf1] sm:$0xff] }
  0x28   : > { %1877 = vmatprep.subr.msk.mxu1 %vm254_vm0, %v2335_v15  ;;  %v2455_v39 = vld [vmem:[%s2273_s7 + $0x108] sm:$0xff]  ;;  %v2475_v43 = vld [vmem:[%s2273_s7 + $0xf8] sm:$0xff]  ;;  %v2495_v47 = vld [vmem:[%s2273_s7 + $0xf0] sm:$0xff] }
  0x29   : > { %v2466_v40 = vld [vmem:[%s2273_s7 + $0x49] sm:$0xff]  ;;  %v2486_v44 = vld [vmem:[%s2273_s7 + $0x39] sm:$0xff]  ;;  %v2506_v48 = vld [vmem:[%s2273_s7 + $0x31] sm:$0xff] }
  0x2a   : > { %1844 = vmatpush3.xpose.msk.msra.mxu0 %vm254_vm0, %v2346_v16  ;;  %v2469_v41 = vld [vmem:[%s2273_s7 + $0x48] sm:$0xff]  ;;  %v2489_v45 = vld [vmem:[%s2273_s7 + $0x38] sm:$0xff]  ;;  %3007 = vst [vmem:[#allocation5_spill] sm:$0xff] %v2506_v48  ;;  %v2509_v49 = vld [vmem:[%s2273_s7 + $0x30] sm:$0xff] }
  0x2b   : > { %1878 = vmatpush3.xpose.msk.msra.mxu1 %vm254_vm0, %v2349_v17  ;;  %1845 = vmatprep.subr.msk.mxu0 %vm254_vm0, %v2352_v18  ;;  %v2512_v50 = vld [vmem:[%s2273_s7 + $0xe1] sm:$0xff]  ;;  %v2532_v54 = vld [vmem:[%s2273_s7 + $0xd9] sm:$0xff]  ;;  %v2552_v58 = vld [vmem:[%s2273_s7 + $0xc9] sm:$0xff] }
  0x2c   : > { %1879 = vmatprep.subr.msk.mxu1 %vm254_vm0, %v2355_v19  ;;  %3008 = vst [vmem:[#allocation6_spill] sm:$0xff] %v2512_v50  ;;  %v2515_v51 = vld [vmem:[%s2273_s7 + $0xe0] sm:$0xff]  ;;  %3010 = vst [vmem:[#allocation8_spill] sm:$0xff] %v2532_v54  ;;  %v2535_v55 = vld [vmem:[%s2273_s7 + $0xd8] sm:$0xff] }
  0x2d   : > { %v2526_v52 = vld [vmem:[%s2273_s7 + $0x21] sm:$0xff]  ;;  %v2546_v56 = vld [vmem:[%s2273_s7 + $0x19] sm:$0xff]  ;;  %v221_v60 = vld [vmem:[%s2273_s7 + $0x9] sm:$0xff] }
  0x2e   : > { %1846 = vmatpush3.xpose.msk.msra.mxu0 %vm254_vm0, %v2366_v20  ;;  %3009 = vst [vmem:[#allocation7_spill] sm:$0xff] %v2526_v52  ;;  %v2529_v53 = vld [vmem:[%s2273_s7 + $0x20] sm:$0xff]  ;;  %3011 = vst [vmem:[#allocation9_spill] sm:$0xff] %v2546_v56  ;;  %v2549_v57 = vld [vmem:[%s2273_s7 + $0x18] sm:$0xff] }
  0x2f   : > { %1880 = vmatpush3.xpose.msk.msra.mxu1 %vm254_vm0, %v2369_v21  ;;  %1847 = vmatprep.subr.msk.mxu0 %vm254_vm0, %v2372_v22  ;;  %v204_v59 = vld [vmem:[%s2273_s7 + $0xc8] sm:$0xff]  ;;  %v203_v63 = vld [vmem:[%s2273_s7 + $0xc0] sm:$0xff] }
  0x30   : > { %1881 = vmatprep.subr.msk.mxu1 %vm254_vm0, %v2375_v23  ;;  %v188_v61 = vld [vmem:[%s2273_s7 + $0x8] sm:$0xff] }
  0x31   : > { %v2565_v62 = vld [vmem:[%s2273_s7 + $0xc1] sm:$0xff] }
  0x32   : > { %1848 = vmatpush3.xpose.msk.msra.mxu0 %vm254_vm0, %v2386_v24 }
  0x33   : > { %1882 = vmatpush3.xpose.msk.msra.mxu1 %vm254_vm0, %v2389_v25  ;;  %1849 = vmatprep.subr.msk.mxu0 %vm254_vm0, %v2392_v26 }
  0x34   : > { %1883 = vmatprep.subr.msk.mxu1 %vm254_vm0, %v2395_v27 }
  0x36   : > { %1850 = vmatpush3.xpose.msk.msra.mxu0 %vm254_vm0, %v2406_v28 }
  0x37   : > { %1884 = vmatpush3.xpose.msk.msra.mxu1 %vm254_vm0, %v2409_v29  ;;  %1851 = vmatprep.subr.msk.mxu0 %vm254_vm0, %v2412_v30 }
  0x38   : > { %1885 = vmatprep.subr.msk.mxu1 %vm254_vm0, %v2415_v31 }
  0x3a   : > { %1852 = vmatpush3.xpose.msk.msra.mxu0 %vm254_vm0, %v2426_v32 }
  0x3b   : > { %1886 = vmatpush3.xpose.msk.msra.mxu1 %vm254_vm0, %v2429_v33  ;;  %1853 = vmatprep.subr.msk.mxu0 %vm254_vm0, %v2432_v34 }
  0x3c   : > { %1887 = vmatprep.subr.msk.mxu1 %vm254_vm0, %v2435_v35 }
  0x3e   : > { %1854 = vmatpush3.xpose.msk.msra.mxu0 %vm254_vm0, %v2446_v36 }
  0x3f   : > { %1888 = vmatpush3.xpose.msk.msra.mxu1 %vm254_vm0, %v2449_v37  ;;  %1855 = vmatprep.subr.msk.mxu0 %vm254_vm0, %v2452_v38 }
  0x40   : > { %1889 = vmatprep.subr.msk.mxu1 %vm254_vm0, %v2455_v39 }
  0x42   : > { %1856 = vmatpush3.xpose.msk.msra.mxu0 %vm254_vm0, %v2466_v40 }
  0x43   : > { %1890 = vmatpush3.xpose.msk.msra.mxu1 %vm254_vm0, %v2469_v41  ;;  %1857 = vmatprep.subr.msk.mxu0 %vm254_vm0, %v2472_v42 }
  0x44   : > { %1891 = vmatprep.subr.msk.mxu1 %vm254_vm0, %v2475_v43 }
  0x46   : > { %1858 = vmatpush3.xpose.msk.msra.mxu0 %vm254_vm0, %v2486_v44 }
  0x47   : > { %1892 = vmatpush3.xpose.msk.msra.mxu1 %vm254_vm0, %v2489_v45  ;;  %1859 = vmatprep.subr.msk.mxu0 %vm254_vm0, %v2492_v46 }
  0x48   : > { %1893 = vmatprep.subr.msk.mxu1 %vm254_vm0, %v2495_v47 }
  0x4a   : > { %1860 = vmatpush3.xpose.msk.msra.mxu0 %vm254_vm0, %v2506_v48  ;;  %v1663_v48 = vld [vmem:[%s2273_s7 + $0x180] sm:$0xff] }
  0x4b   : > { %1894 = vmatpush3.xpose.msk.msra.mxu1 %vm254_vm0, %v2509_v49  ;;  %1861 = vmatprep.subr.msk.mxu0 %vm254_vm0, %v2512_v50  ;;  %v1664_v50 = vld [vmem:[%s2273_s7 + $0x188] sm:$0xff] }
  0x4c   : > { %1895 = vmatprep.subr.msk.mxu1 %vm254_vm0, %v2515_v51 }
  0x4e   : > { %1862 = vmatpush3.xpose.msk.msra.mxu0 %vm254_vm0, %v2526_v52  ;;  %v2576_v52 = vld [vmem:[%s2273_s7 + $0x172] sm:$0xff] }
  0x4f   : > { %1896 = vmatpush3.xpose.msk.msra.mxu1 %vm254_vm0, %v2529_v53  ;;  %1863 = vmatprep.subr.msk.mxu0 %vm254_vm0, %v2532_v54  ;;  %v187_v54 = vld [vmem:[%s2273_s7] sm:$0xff] }
  0x50   : > { %1897 = vmatprep.subr.msk.mxu1 %vm254_vm0, %v2535_v55 }
  0x52   : > { %1864 = vmatpush3.xpose.msk.msra.mxu0 %vm254_vm0, %v2546_v56  ;;  %v220_v56 = vld [vmem:[%s2273_s7 + $0x1] sm:$0xff] }
  0x53   : > { %1898 = vmatpush3.xpose.msk.msra.mxu1 %vm254_vm0, %v2549_v57  ;;  %1865 = vmatprep.subr.msk.mxu0 %vm254_vm0, %v2552_v58 }
  0x54   : > { %1899 = vmatprep.subr.msk.mxu1 %vm254_vm0, %v204_v59 }
  0x56   : > { %1866 = vmatpush3.xpose.msk.msra.mxu0 %vm254_vm0, %v221_v60  ;;  %v2585_v60 = vld [vmem:[%s2273_s7 + $0xb2] sm:$0xff] }
  0x57   : > { %1900 = vmatpush3.xpose.msk.msra.mxu1 %vm254_vm0, %v188_v61  ;;  %1867 = vmatprep.subr.msk.mxu0 %vm254_vm0, %v2565_v62  ;;  %v2588_v61 = vld [vmem:[%s2273_s7 + $0x16a] sm:$0xff] }
  0x58   : > { %1901 = vmatprep.subr.msk.mxu1 %vm254_vm0, %v203_v63 }
  0x5a   : > { %1868 = vmatpush3.xpose.msk.msra.mxu0 %vm254_vm0, %v220_v56  ;;  %v2632_v56 = vld [vmem:[%s2273_s7 + $0x152] sm:$0xff] }
  0x5b   : > { %1902 = vmatpush3.xpose.msk.msra.mxu1 %vm254_vm0, %v187_v54  ;;  %1905 = vmatprep.subr.msk.mxu0 %vm254_vm0, %v2576_v52  ;;  %v2598_v54 = vld [vmem:[%s2996_s1 + $0x10] sm:$0xff] }
  0x5c   : > { %1939 = vmatprep.subr.msk.mxu1 %vm254_vm0, %v1664_v50  ;;  %v2603_v50 = vld [vmem:[%s2996_s1 + $0x18] sm:$0xff] }
  0x5d   : > { %1870 = vmatmul.mubr.msk.f32.vlgmr.msra.gmra.mxu0 %vm254_vm0, %v2258_v0  ;;  %v2612_v0 = vld [vmem:[%s2273_s7 + $0xaa] sm:$0xff] }
  0x5e   : > { %1904 = vmatmul.mubr.msk.f32.vlgmr.msra.gmra.mxu1 %vm254_vm0, %v2263_v1  ;;  %1906 = vmatpush3.xpose.msk.msra.mxu0 %vm254_vm0, %v2585_v60  ;;  %v2615_v1 = vld [vmem:[%s2273_s7 + $0x15a] sm:$0xff] }
  0x5f   : > { %1940 = vmatpush3.xpose.msk.msra.mxu1 %vm254_vm0, %v204_v59  ;;  %1907 = vmatprep.subr.msk.mxu0 %vm254_vm0, %v2588_v61  ;;  %v2643_v59 = vld [vmem:[%s2273_s7 + $0x92] sm:$0xff] }
  0x60   : > { %1941 = vmatprep.subr.msk.mxu1 %vm254_vm0, %v1663_v48  ;;  %1937 = vmatprep.mubr.msk.f32.mxu0 %vm254_vm0, %v2598_v54  ;;  %v2629_v48 = vld [vmem:[%s2273_s7 + $0x9a] sm:$0xff] }
  0x61   : > { %1971 = vmatprep.mubr.msk.f32.mxu1 %vm254_vm0, %v2603_v50 }
  0x62   : > { %1908 = vmatpush3.xpose.msk.msra.mxu0 %vm254_vm0, %v2612_v0 }
  0x63   : > { %1942 = vmatpush3.xpose.msk.msra.mxu1 %vm254_vm0, %v203_v63  ;;  %1909 = vmatprep.subr.msk.mxu0 %vm254_vm0, %v2615_v1  ;;  %v611_v63 = vld [vmem:[%s2273_s7 + $0xc2] sm:$0xff] }
  0x64   : > { %1943 = vmatprep.subr.msk.mxu1 %vm254_vm0, %v2279_v3  ;;  %v2646_v3 = vld [vmem:[%s2273_s7 + $0x142] sm:$0xff] }
  0x66   : > { %1910 = vmatpush3.xpose.msk.msra.mxu0 %vm254_vm0, %v2629_v48 }
  0x67   : > { %1944 = vmatpush3.xpose.msk.msra.mxu1 %vm254_vm0, %v2289_v5  ;;  %1911 = vmatprep.subr.msk.mxu0 %vm254_vm0, %v2632_v56  ;;  %v2657_v5 = vld [vmem:[%s2273_s7 + $0x82] sm:$0xff] }
  0x68   : > { %1945 = vmatprep.subr.msk.mxu1 %vm254_vm0, %v2295_v7  ;;  %v2660_v7 = vld [vmem:[%s2273_s7 + $0x13a] sm:$0xff] }
  0x6a   : > { %1912 = vmatpush3.xpose.msk.msra.mxu0 %vm254_vm0, %v2643_v59 }
  0x6b   : > { %1946 = vmatpush3.xpose.msk.msra.mxu1 %vm254_vm0, %v2309_v9  ;;  %1913 = vmatprep.subr.msk.mxu0 %vm254_vm0, %v2646_v3  ;;  %v2671_v9 = vld [vmem:[%s2273_s7 + $0x7a] sm:$0xff] }
  0x6c   : > { %1947 = vmatprep.subr.msk.mxu1 %vm254_vm0, %v2315_v11  ;;  %v2674_v11 = vld [vmem:[%s2273_s7 + $0x12a] sm:$0xff] }
  0x6e   : > { %1914 = vmatpush3.xpose.msk.msra.mxu0 %vm254_vm0, %v2657_v5 }
  0x6f   : > { %1948 = vmatpush3.xpose.msk.msra.mxu1 %vm254_vm0, %v2329_v13  ;;  %1915 = vmatprep.subr.msk.mxu0 %vm254_vm0, %v2660_v7  ;;  %v2685_v13 = vld [vmem:[%s2273_s7 + $0x6a] sm:$0xff] }
  0x70   : > { %1949 = vmatprep.subr.msk.mxu1 %vm254_vm0, %v2335_v15  ;;  %v2688_v15 = vld [vmem:[%s2273_s7 + $0x122] sm:$0xff] }
  0x72   : > { %1916 = vmatpush3.xpose.msk.msra.mxu0 %vm254_vm0, %v2671_v9 }
  0x73   : > { %1950 = vmatpush3.xpose.msk.msra.mxu1 %vm254_vm0, %v2349_v17  ;;  %1917 = vmatprep.subr.msk.mxu0 %vm254_vm0, %v2674_v11  ;;  %v2699_v17 = vld [vmem:[%s2273_s7 + $0x62] sm:$0xff] }
  0x74   : > { %1951 = vmatprep.subr.msk.mxu1 %vm254_vm0, %v2355_v19  ;;  %v2702_v19 = vld [vmem:[%s2273_s7 + $0x112] sm:$0xff] }
  0x76   : > { %1918 = vmatpush3.xpose.msk.msra.mxu0 %vm254_vm0, %v2685_v13 }
  0x77   : > { %1952 = vmatpush3.xpose.msk.msra.mxu1 %vm254_vm0, %v2369_v21  ;;  %1919 = vmatprep.subr.msk.mxu0 %vm254_vm0, %v2688_v15  ;;  %v2713_v21 = vld [vmem:[%s2273_s7 + $0x52] sm:$0xff] }
  0x78   : > { %1953 = vmatprep.subr.msk.mxu1 %vm254_vm0, %v2375_v23  ;;  %v2716_v23 = vld [vmem:[%s2273_s7 + $0x10a] sm:$0xff] }
  0x7a   : > { %1920 = vmatpush3.xpose.msk.msra.mxu0 %vm254_vm0, %v2699_v17 }
  0x7b   : > { %1954 = vmatpush3.xpose.msk.msra.mxu1 %vm254_vm0, %v2389_v25  ;;  %1921 = vmatprep.subr.msk.mxu0 %vm254_vm0, %v2702_v19  ;;  %v2727_v25 = vld [vmem:[%s2273_s7 + $0x4a] sm:$0xff] }
  0x7c   : > { %1955 = vmatprep.subr.msk.mxu1 %vm254_vm0, %v2395_v27  ;;  %v2730_v27 = vld [vmem:[%s2273_s7 + $0xfa] sm:$0xff] }
  0x7e   : > { %1922 = vmatpush3.xpose.msk.msra.mxu0 %vm254_vm0, %v2713_v21 }
  0x7f   : > { %1956 = vmatpush3.xpose.msk.msra.mxu1 %vm254_vm0, %v2409_v29  ;;  %1923 = vmatprep.subr.msk.mxu0 %vm254_vm0, %v2716_v23  ;;  %v2741_v29 = vld [vmem:[%s2273_s7 + $0x3a] sm:$0xff] }
  0x80   : > { %1957 = vmatprep.subr.msk.mxu1 %vm254_vm0, %v2415_v31  ;;  %v2744_v31 = vld [vmem:[%s2273_s7 + $0xf2] sm:$0xff] }
  0x82   : > { %1924 = vmatpush3.xpose.msk.msra.mxu0 %vm254_vm0, %v2727_v25 }
  0x83   : > { %1958 = vmatpush3.xpose.msk.msra.mxu1 %vm254_vm0, %v2429_v33  ;;  %1925 = vmatprep.subr.msk.mxu0 %vm254_vm0, %v2730_v27  ;;  %v2755_v33 = vld [vmem:[%s2273_s7 + $0x32] sm:$0xff] }
  0x84   : > { %1959 = vmatprep.subr.msk.mxu1 %vm254_vm0, %v2435_v35  ;;  %v2758_v35 = vld [vmem:[%s2273_s7 + $0xe2] sm:$0xff] }
  0x86   : > { %1926 = vmatpush3.xpose.msk.msra.mxu0 %vm254_vm0, %v2741_v29 }
  0x87   : > { %1960 = vmatpush3.xpose.msk.msra.mxu1 %vm254_vm0, %v2449_v37  ;;  %1927 = vmatprep.subr.msk.mxu0 %vm254_vm0, %v2744_v31  ;;  %v2769_v37 = vld [vmem:[%s2273_s7 + $0x22] sm:$0xff] }
  0x88   : > { %1961 = vmatprep.subr.msk.mxu1 %vm254_vm0, %v2455_v39  ;;  %v2772_v39 = vld [vmem:[%s2273_s7 + $0xda] sm:$0xff] }
  0x8a   : > { %1928 = vmatpush3.xpose.msk.msra.mxu0 %vm254_vm0, %v2755_v33 }
  0x8b   : > { %1962 = vmatpush3.xpose.msk.msra.mxu1 %vm254_vm0, %v2469_v41  ;;  %1929 = vmatprep.subr.msk.mxu0 %vm254_vm0, %v2758_v35  ;;  %v2783_v41 = vld [vmem:[%s2273_s7 + $0x1a] sm:$0xff] }
  0x8c   : > { %1963 = vmatprep.subr.msk.mxu1 %vm254_vm0, %v2475_v43  ;;  %3012 = vst [vmem:[#allocation10_spill] sm:$0xff] %v2783_v41  ;;  %v612_v43 = vld [vmem:[%s2273_s7 + $0xca] sm:$0xff] }
  0x8e   : > { %1930 = vmatpush3.xpose.msk.msra.mxu0 %vm254_vm0, %v2769_v37 }
  0x8f   : > { %1964 = vmatpush3.xpose.msk.msra.mxu1 %vm254_vm0, %v2489_v45  ;;  %1931 = vmatprep.subr.msk.mxu0 %vm254_vm0, %v2772_v39  ;;  %v596_v45 = vld [vmem:[%s2273_s7 + $0xa] sm:$0xff] }
  0x90   : > { %1965 = vmatprep.subr.msk.mxu1 %vm254_vm0, %v2495_v47  ;;  %v595_v47 = vld [vmem:[%s2273_s7 + $0x2] sm:$0xff] }
  0x92   : > { %1932 = vmatpush3.xpose.msk.msra.mxu0 %vm254_vm0, %v2783_v41  ;;  %v1796_v41 = vld [vmem:[%s2273_s7 + $0x18a] sm:$0xff] }
  0x93   : > { %1966 = vmatpush3.xpose.msk.msra.mxu1 %vm254_vm0, %v2509_v49  ;;  %1933 = vmatprep.subr.msk.mxu0 %vm254_vm0, %v612_v43  ;;  %v1730_v49 = vld [vmem:[%s2273_s7 + $0x189] sm:$0xff] }
  0x94   : > { %1967 = vmatprep.subr.msk.mxu1 %vm254_vm0, %v2515_v51  ;;  %v1729_v51 = vld [vmem:[%s2273_s7 + $0x181] sm:$0xff] }
  0x96   : > { %1934 = vmatpush3.xpose.msk.msra.mxu0 %vm254_vm0, %v596_v45  ;;  %v1795_v45 = vld [vmem:[%s2273_s7 + $0x182] sm:$0xff] }
  0x97   : > { %1968 = vmatpush3.xpose.msk.msra.mxu1 %vm254_vm0, %v2529_v53  ;;  %1935 = vmatprep.subr.msk.mxu0 %vm254_vm0, %v611_v63  ;;  %v2818_v53 = vld [vmem:[%s2996_s1 + $0x20] sm:$0xff] }
  0x98   : > { %1969 = vmatprep.subr.msk.mxu1 %vm254_vm0, %v2535_v55  ;;  %v2823_v55 = vld [vmem:[%s2996_s1 + $0x28] sm:$0xff] }
  0x9a   : > { %1936 = vmatpush3.xpose.msk.msra.mxu0 %vm254_vm0, %v595_v47 }
  0x9b   : > { %1970 = vmatpush3.xpose.msk.msra.mxu1 %vm254_vm0, %v2549_v57  ;;  %1973 = vmatprep.subr.msk.mxu0 %vm254_vm0, %v1730_v49  ;;  %v2177_v57 = vmov 0  }
  0x9c   : > { %2007 = vmatprep.subr.msk.mxu1 %vm254_vm0, %v1796_v41  ;;  %2098 = vset.pattern.permute.xlu0 %v2177_v57 }
  0x9d   : > { %1938 = vmatmul.mubr.msk.f32.vlgmr.msra.gmra.mxu0 %vm254_vm0, %v2598_v54  ;;  %v1422_v54 = vld [vmem:[%s2997_s2] sm:$0xff] }
  0x9e   : > { %1972 = vmatmul.mubr.msk.f32.vlgmr.msra.gmra.mxu1 %vm254_vm0, %v2603_v50  ;;  %1974 = vmatpush3.xpose.msk.msra.mxu0 %vm254_vm0, %v2552_v58 }
  0x9f   : > { %2008 = vmatpush3.xpose.msk.msra.mxu1 %vm254_vm0, %v612_v43  ;;  %1975 = vmatprep.subr.msk.mxu0 %vm254_vm0, %v1729_v51 }
  0xa0   : > { %2009 = vmatprep.subr.msk.mxu1 %vm254_vm0, %v1795_v45  ;;  %2005 = vmatprep.mubr.msk.f32.mxu0 %vm254_vm0, %v2818_v53 }
  0xa1   : > { %2039 = vmatprep.mubr.msk.f32.mxu1 %vm254_vm0, %v2823_v55  ;;  %1425 = vperm.xlu0 %2098, %v1422_v54  }
  0xa2   : > { %1976 = vmatpush3.xpose.msk.msra.mxu0 %vm254_vm0, %v2565_v62 }
  0xa3   : > { %2010 = vmatpush3.xpose.msk.msra.mxu1 %vm254_vm0, %v611_v63  ;;  %1977 = vmatprep.subr.msk.mxu0 %vm254_vm0, %v2276_v2  ;;  %v3013_v2 = vld [vmem:[#allocation5_spill] sm:$0xff] }
  0xa4   : > { %2011 = vmatprep.subr.msk.mxu1 %vm254_vm0, %v2576_v52 }
  0xa6   : > { %1978 = vmatpush3.xpose.msk.msra.mxu0 %vm254_vm0, %v2282_v4  ;;  %v3014_v4 = vld [vmem:[#allocation6_spill] sm:$0xff] }
  0xa7   : > { %2012 = vmatpush3.xpose.msk.msra.mxu1 %vm254_vm0, %v2585_v60  ;;  %1979 = vmatprep.subr.msk.mxu0 %vm254_vm0, %v2292_v6  ;;  %v3015_v6 = vld [vmem:[#allocation7_spill] sm:$0xff] }
  0xa8   : > { %2013 = vmatprep.subr.msk.mxu1 %vm254_vm0, %v2588_v61 }
  0xaa   : > { %1980 = vmatpush3.xpose.msk.msra.mxu0 %vm254_vm0, %v2306_v8  ;;  %v3016_v8 = vld [vmem:[#allocation8_spill] sm:$0xff] }
  0xab   : > { %2014 = vmatpush3.xpose.msk.msra.mxu1 %vm254_vm0, %v2612_v0  ;;  %1981 = vmatprep.subr.msk.mxu0 %vm254_vm0, %v2312_v10  ;;  %v3017_v10 = vld [vmem:[#allocation9_spill] sm:$0xff] }
  0xac   : > { %2015 = vmatprep.subr.msk.mxu1 %vm254_vm0, %v2615_v1 }
  0xae   : > { %1982 = vmatpush3.xpose.msk.msra.mxu0 %vm254_vm0, %v2326_v12  ;;  %v3018_v12 = vld [vmem:[#allocation10_spill] sm:$0xff] }
  0xaf   : > { %2016 = vmatpush3.xpose.msk.msra.mxu1 %vm254_vm0, %v2629_v48  ;;  %1983 = vmatprep.subr.msk.mxu0 %vm254_vm0, %v2332_v14 }
  0xb0   : > { %2017 = vmatprep.subr.msk.mxu1 %vm254_vm0, %v2632_v56 }
  0xb2   : > { %1984 = vmatpush3.xpose.msk.msra.mxu0 %vm254_vm0, %v2346_v16 }
  0xb3   : > { %2018 = vmatpush3.xpose.msk.msra.mxu1 %vm254_vm0, %v2643_v59  ;;  %1985 = vmatprep.subr.msk.mxu0 %vm254_vm0, %v2352_v18 }
  0xb4   : > { %2019 = vmatprep.subr.msk.mxu1 %vm254_vm0, %v2646_v3 }
  0xb6   : > { %1986 = vmatpush3.xpose.msk.msra.mxu0 %vm254_vm0, %v2366_v20 }
  0xb7   : > { %2020 = vmatpush3.xpose.msk.msra.mxu1 %vm254_vm0, %v2657_v5  ;;  %1987 = vmatprep.subr.msk.mxu0 %vm254_vm0, %v2372_v22 }
  0xb8   : > { %2021 = vmatprep.subr.msk.mxu1 %vm254_vm0, %v2660_v7 }
  0xba   : > { %1988 = vmatpush3.xpose.msk.msra.mxu0 %vm254_vm0, %v2386_v24 }
  0xbb   : > { %2022 = vmatpush3.xpose.msk.msra.mxu1 %vm254_vm0, %v2671_v9  ;;  %1989 = vmatprep.subr.msk.mxu0 %vm254_vm0, %v2392_v26 }
  0xbc   : > { %2023 = vmatprep.subr.msk.mxu1 %vm254_vm0, %v2674_v11 }
  0xbe   : > { %1990 = vmatpush3.xpose.msk.msra.mxu0 %vm254_vm0, %v2406_v28 }
  0xbf   : > { %2024 = vmatpush3.xpose.msk.msra.mxu1 %vm254_vm0, %v2685_v13  ;;  %1991 = vmatprep.subr.msk.mxu0 %vm254_vm0, %v2412_v30 }
  0xc0   : > { %2025 = vmatprep.subr.msk.mxu1 %vm254_vm0, %v2688_v15 }
  0xc2   : > { %1992 = vmatpush3.xpose.msk.msra.mxu0 %vm254_vm0, %v2426_v32 }
  0xc3   : > { %2026 = vmatpush3.xpose.msk.msra.mxu1 %vm254_vm0, %v2699_v17  ;;  %1993 = vmatprep.subr.msk.mxu0 %vm254_vm0, %v2432_v34 }
  0xc4   : > { %2027 = vmatprep.subr.msk.mxu1 %vm254_vm0, %v2702_v19 }
  0xc6   : > { %1994 = vmatpush3.xpose.msk.msra.mxu0 %vm254_vm0, %v2446_v36 }
  0xc7   : > { %2028 = vmatpush3.xpose.msk.msra.mxu1 %vm254_vm0, %v2713_v21  ;;  %1995 = vmatprep.subr.msk.mxu0 %vm254_vm0, %v2452_v38 }
  0xc8   : > { %2029 = vmatprep.subr.msk.mxu1 %vm254_vm0, %v2716_v23 }
  0xca   : > { %1996 = vmatpush3.xpose.msk.msra.mxu0 %vm254_vm0, %v2466_v40 }
  0xcb   : > { %2030 = vmatpush3.xpose.msk.msra.mxu1 %vm254_vm0, %v2727_v25  ;;  %1997 = vmatprep.subr.msk.mxu0 %vm254_vm0, %v2472_v42 }
  0xcc   : > { %2031 = vmatprep.subr.msk.mxu1 %vm254_vm0, %v2730_v27 }
  0xce   : > { %1998 = vmatpush3.xpose.msk.msra.mxu0 %vm254_vm0, %v2486_v44 }
  0xcf   : > { %2032 = vmatpush3.xpose.msk.msra.mxu1 %vm254_vm0, %v2741_v29  ;;  %1999 = vmatprep.subr.msk.mxu0 %vm254_vm0, %v2492_v46 }
  0xd0   : > { %2033 = vmatprep.subr.msk.mxu1 %vm254_vm0, %v2744_v31 }
  0xd2   : > { %2000 = vmatpush3.xpose.msk.msra.mxu0 %vm254_vm0, %v3013_v2 }
  0xd3   : > { %2034 = vmatpush3.xpose.msk.msra.mxu1 %vm254_vm0, %v2755_v33  ;;  %2001 = vmatprep.subr.msk.mxu0 %vm254_vm0, %v3014_v4 }
  0xd4   : > { %2035 = vmatprep.subr.msk.mxu1 %vm254_vm0, %v2758_v35 }
  0xd6   : > { %2002 = vmatpush3.xpose.msk.msra.mxu0 %vm254_vm0, %v3015_v6 }
  0xd7   : > { %2036 = vmatpush3.xpose.msk.msra.mxu1 %vm254_vm0, %v2769_v37  ;;  %2003 = vmatprep.subr.msk.mxu0 %vm254_vm0, %v3016_v8 }
  0xd8   : > { %2037 = vmatprep.subr.msk.mxu1 %vm254_vm0, %v2772_v39 }
  0xda   : > { %2004 = vmatpush3.xpose.msk.msra.mxu0 %vm254_vm0, %v3017_v10 }
  0xdb   : > { %2038 = vmatpush3.xpose.msk.msra.mxu1 %vm254_vm0, %v3018_v12 }
  0xdd   : > { %2006 = vmatmul.mubr.msk.f32.vlgmr.msra.gmra.mxu0 %vm254_vm0, %v2818_v53 }
  0xde   : > { %2040 = vmatmul.mubr.msk.f32.vlgmr.msra.gmra.mxu1 %vm254_vm0, %v2823_v55 }
 0x11c   : > { %v1426_v58 = vpop.permute.xlu0 %1425 }
 0x11d   : > { %v420_v14 = vpop.f32.mrf.mxu0 }
 0x11e   : > { %v590_v16 = vpop.f32.mrf.mxu1 }
 0x11f   : > { %v422_v18 = vpop.f32.mrf.mxu0  ;;  %v591_v24 = vadd.f32 %v590_v16, %v420_v14 }
 0x120   : > { %v592_v22 = vpop.f32.mrf.mxu1 }
 0x121   : > { %v593_v30 = vadd.f32 %v592_v22, %v422_v18 }
 0x15d   : > { %v794_v20 = vpop.f32.mrf.mxu0 }
 0x15e   : > { %v1003_v26 = vpop.f32.mrf.mxu1  ;;  %v799_v32 = vadd.f32 %v794_v20, %v591_v24 }
 0x15f   : > { %v796_v28 = vpop.f32.mrf.mxu0 }
 0x160   : > { %v800_v34 = vadd.f32 %v796_v28, %v593_v30  ;;  %v1005_v36 = vpop.f32.mrf.mxu1  ;;  %v1008_v38 = vadd.f32 %v1003_v26, %v799_v32 }
 0x162   : > { %v1009_v44 = vadd.f32 %v1005_v36, %v800_v34 }
 0x19d   : > { %v1209_v40 = vpop.f32.mrf.mxu0 }
 0x19e   : > { %v1415_v42 = vpop.f32.mrf.mxu1  ;;  %v1214_v46 = vadd.f32 %v1209_v40, %v1008_v38 }
 0x19f   : > { %v1211_v52 = vpop.f32.mrf.mxu0 }
 0x1a0   : > { %v1420_v62 = vadd.f32 %v1415_v42, %v1214_v46  ;;  %v1215_v60 = vadd.f32 %v1211_v52, %v1009_v44  ;;  %v1417_v61 = vpop.f32.mrf.mxu1 }
 0x1a2   : > { %v1421_v50 = vadd.f32 %v1417_v61, %v1215_v60  ;;  %v1428_v0 = vadd.f32 %v1426_v58, %v1420_v62 }
 0x1a4   : > { %v1429_v1 = vadd.f32 %v1426_v58, %v1421_v50  ;;  %1430 = vst [vmem:[%s177_s4] sm:$0xff] %v1428_v0 }
 0x1a6   : > { %1431 = vst [vmem:[%s177_s4 + $0x8] sm:$0xff] %v1429_v1 }
 0x1a7   : > { %2112 = shalt.err (!%p2109_p5)
}
 0x1a8   : > { %s2113_s19 = scalar_lea.hbm %s1447_s8, 256  ;;  %s2117_s26 = scalar_lea.hbm %s2998_s3, 512 }
 0x1a9   : > { %p2114_p6 = scmp.ne.s32.totalorder %s1447_s8, %s2113_s19  ;;  %p2118_p10 = scmp.lt.s32.totalorder %s1447_s8, %s2998_s3 }
 0x1aa   : > { %p2119_p11 = scmp.lt.s32.totalorder %s2117_s26, %s2113_s19 }
 0x1ab   : > { %p2115_p7 = pnand %p2114_p6, %p2239_p4 }
 0x1ac   : > { %p2120_p12 = por %p2119_p11, %p2118_p10 }
 0x1ad   : > { %p2116_p9 = pneg %p2115_p7 }
 0x1af   : > { %p2121_p13 = pnand %p2120_p12, %p2116_p9 }
 0x1b1   : > { %2124 = shalt.err (!%p2121_p13)
}
 0x1b2   : > { %2042 = dma.vmem_to_hbm [thread:$0]  (%p2239_p4), %s1450_s5, 256, %s1447_s8, %s1433_s9  }
 0x1b3 PF: > { %p2048_p0 = scmp.ge.s32.totalorder %s2175_s17, 2  ;;  %s1461_s29 = sand.u32 1, %s2155_s12  }
 0x1b4   : > { %s1462_s30 = scalar_lea.sflag [#allocation3], %s1461_s29 }
 0x1b5   : > { %p2045_p1 = pnand %p2048_p0, %p2246_p8 }
 0x1b7   : > { %p2046_p2 = pneg %p2045_p1 }
 0x1b9   : > { %2150 = dma.done.wait (%p2046_p2), %s1462_s30, 256  }
 0x1ba   : > { %2152 = vsyncadd (%p2046_p2), %s1462_s30, 4294967040  ;;  %s16_s17 = sadd.s32 1, %s2175_s17   ;;  %s3019_s12 = smov %s2159_s13 }
 0x1bb   : > { %p13_p3 = scmp.ge.s32.totalorder %s16_s17, 4   ;;  %s3020_s13 = smov %s2163_s14 }
 0x1bc   : > { %s3021_s14 = smov %s2252_s25  ;;  %s3022_s15 = smov %s2171_s16 }
 0x1bd   : > { %s3023_s16 = smov %s3025_s20  ;;  %15 = sbr.rel (!%p13_p3) target bundleno = 4 (0x4), region = 74 }
 0x1c2   :  { %1467 = vsyncpa [#allocation3], 1 }
 0x1c3   :  { %1469 = vsyncpa [#allocation3 + $0x1], 1 }

</bundles_post_ra>
